<compile_context>
chip_gen: v5e
topology: v5e:2x2
jax: 0.10.0
libtpu: 0.0.40
codegen_flags: <defaults>
</compile_context>

<pallas_src>
import jax
import jax.numpy as jnp
from jax.experimental import pallas as pl
from jax.experimental.pallas import tpu as pltpu


def build_linear_layer_params(obs_frames: int, pred_frames: int, diff: float = 0.95):
    """Deterministically build W (2,h) and A_p (f,2) exactly as the PyTorch __init__."""
    h, f = obs_frames, pred_frames
    if diff == 0:
        p_diag = jnp.ones((h,), jnp.float32)
    else:
        logits = jnp.array([(i + 1) ** diff for i in range(h)], dtype=jnp.float32)
        p_diag = jax.nn.softmax(logits)
    P = jnp.diag(p_diag)                                           # (h, h)
    xs = jnp.arange(h, dtype=jnp.float32)
    xp = jnp.arange(f, dtype=jnp.float32) + h
    A = jnp.stack([jnp.ones((h,), jnp.float32), xs]).T             # (h, 2)
    A_p = jnp.stack([jnp.ones((f,), jnp.float32), xp]).T           # (f, 2)
    W = jnp.linalg.inv(A.T @ P @ A) @ A.T @ P                      # (2, h)
    return W, A_p


def _round_up(x: int, m: int) -> int:
    return ((x + m - 1) // m) * m


def _linear_pred_kernel(k_ref, x_ref, o_ref):
    # k_ref: (h*dim, f*dim)  folded matrix kron((A_p@W).T, I_dim), grid-resident
    # x_ref: (b_tile, h*dim) streamed contiguous view of (b_tile, h, dim)
    # o_ref: (b_tile, f*dim) streamed contiguous view of (b_tile, f, dim)
    x = x_ref[...].astype(jnp.float32)   # bf16 inputs stream at half read BW
    y = jnp.dot(x, k_ref[...], preferred_element_type=jnp.float32)
    o_ref[...] = y.astype(o_ref.dtype)


def linear_layer_nd(inputs: jax.Array, W: jax.Array, A_p: jax.Array, *,
                    out_dtype=jnp.float32,
                    min_pallas_elems: int = 8192,
                    target_step_bytes: int = 4 << 20,
                    min_step_bytes: int = 1 << 20,
                    max_batch_tile: int = 65536) -> jax.Array:
    """inputs: (batch, obs, dim) -> (batch, pred, dim).

    Computes out[b, :, d] = A_p @ W @ inputs[b, :, d] for every batch / coord
    dim, matching LinearLayerND.forward (inputs cast to float32 internally).
    """
    B, h, dim = inputs.shape
    f = A_p.shape[0]
    hd, fd = h * dim, f * dim

    # Fold the two matmuls once in the wrapper: M = A_p @ W, shape (f, h).
    M = A_p.astype(jnp.float32) @ W.astype(jnp.float32)

    # Small-N fast path: pallas_call launch / single grid step is pure overhead.
    if B * dim < min_pallas_elems:
        out = jnp.einsum("fh,bhd->bfd", M, inputs.astype(jnp.float32))
        return out.astype(out_dtype)

    # Kronecker fold: out.reshape(B, f*dim) = inputs.reshape(B, h*dim) @ K with
    # K = kron(M.T, I_dim). Both reshapes are zero-copy on contiguous arrays.
    K = jnp.kron(M.T, jnp.eye(dim, dtype=jnp.float32))             # (h*dim, f*dim)
    x2 = inputs.reshape(B, hd)                                     # free view

    in_bytes = jnp.dtype(inputs.dtype).itemsize
    out_bytes = jnp.dtype(out_dtype).itemsize
    row_bytes = hd * in_bytes + fd * out_bytes

    # Batch tile: MiB-scale HBM traffic per grid step (amortizes ~0.35us/step).
    b_tile = max(8, (target_step_bytes // row_bytes) // 8 * 8)
    # Give v7x's two TensorCores work (>= 4 grid steps) whenever every step
    # still moves >= min_step_bytes.
    min_rows = max(8, min_step_bytes // row_bytes)
    if B >= 4 * min_rows:
        b_tile = min(b_tile, _round_up(-(-B // 4), 8))
    b_tile = min(b_tile, max(8, (max_batch_tile // 8) * 8))
    if b_tile >= B:
        b_tile = B   # single full-extent block (block == full dim: always legal)
    grid = (pl.cdiv(B, b_tile),)   # ragged last block handled by Pallas, no pad

    # Explicit scoped-VMEM: double buffers for streamed blocks + K + headroom.
    needed = 2 * b_tile * row_bytes + hd * fd * 4 + (2 << 20)
    vmem_limit = int(max(needed, 16 << 20))

    out2 = pl.pallas_call(
        _linear_pred_kernel,
        out_shape=jax.ShapeDtypeStruct((B, fd), out_dtype),
        grid=grid,
        in_specs=[
            # K replicated across the grid -> loaded once, stays resident.
            pl.BlockSpec((hd, fd), lambda i: (0, 0)),
            # Streamed contiguous input slab (no wrapper-side transpose/pad).
            pl.BlockSpec((b_tile, hd), lambda i: (i, 0)),
        ],
        out_specs=pl.BlockSpec((b_tile, fd), lambda i: (i, 0)),
        compiler_params=pltpu.CompilerParams(
            dimension_semantics=("parallel",),
            vmem_limit_bytes=vmem_limit,
        ),
    )(K, x2)

    return out2.reshape(B, f, dim)                                 # free view


if __name__ == "__main__":
    obs_frames = 8
    pred_frames = 12

    W, A_p = build_linear_layer_params(obs_frames, pred_frames, diff=0.95)
    M_ref = A_p @ W                                                # (f, h)

    # 1) Tiny batch (module docstring shape (batch, obs, 2)): einsum fast path.
    x1 = jax.random.normal(jax.random.PRNGKey(0), (2, obs_frames, 2), jnp.float32)
    o1 = jax.block_until_ready(linear_layer_nd(x1, W, A_p))
    r1 = jnp.einsum("fh,bhd->bfd", M_ref, x1)
    assert o1.shape == (2, pred_frames, 2)
    assert jnp.allclose(o1, r1, atol=1e-4, rtol=1e-4)

    # 2) Force the Pallas path at a tiny shape (single, ragged grid block).
    x2 = jax.random.normal(jax.random.PRNGKey(1), (2, obs_frames, 4), jnp.float32)
    o2 = jax.block_until_ready(linear_layer_nd(x2, W, A_p, min_pallas_elems=0))
    r2 = jnp.einsum("fh,bhd->bfd", M_ref, x2)
    assert o2.shape == (2, pred_frames, 4)
    assert jnp.allclose(o2, r2, atol=1e-4, rtol=1e-4)

    # 3) Larger batch: default dispatch to Pallas, multi-step grid with a
    #    ragged final block (max_batch_tile caps the tile to force 5 steps).
    x3 = jax.random.normal(jax.random.PRNGKey(2), (5000, obs_frames, 2), jnp.float32)
    o3 = jax.block_until_ready(linear_layer_nd(x3, W, A_p, max_batch_tile=1024))
    r3 = jnp.einsum("fh,bhd->bfd", M_ref, x3)
    assert o3.shape == (5000, pred_frames, 2)
    assert jnp.allclose(o3, r3, atol=1e-4, rtol=1e-4)

    # 4) bf16 input streaming (no wrapper cast; f32 accumulate in-kernel).
    x4 = x3.astype(jnp.bfloat16)
    o4 = jax.block_until_ready(linear_layer_nd(x4, W, A_p, max_batch_tile=1024))
    r4 = jnp.einsum("fh,bhd->bfd", M_ref, x4.astype(jnp.float32))
    assert o4.dtype == jnp.float32
    assert jnp.allclose(o4, r4, atol=2e-2, rtol=1e-2)

    print("KERNEL_OK")
</pallas_src>

<mosaic_0001>
module attributes {stable_mosaic.version = 11 : i64} {
  func.func @_linear_pred_kernel(%arg0: i32, %arg1: memref<32x48xf32, #tpu.memory_space<vmem>>, %arg2: memref<2x32xf32, #tpu.memory_space<vmem>>, %arg3: memref<2x48xf32, #tpu.memory_space<vmem>>) attributes {dimension_semantics = [#tpu.dimension_semantics<parallel>], iteration_bounds = array<i64: 1>, scalar_prefetch = 0 : i64, scratch_operands = 0 : i64, tpu.core_type = #tpu.core_type<tc>, window_params = [{pipeline_mode = #tpu.pipeline_mode<synchronous>, transform_indices = @transform_0, window_bounds = array<i64: 32, 48>}, {transform_indices = @transform_1, window_bounds = array<i64: 2, 32>}, {transform_indices = @transform_2, window_bounds = array<i64: 2, 48>}]} {
    %c0 = arith.constant 0 : index
    %c0_0 = arith.constant 0 : index
    %0 = vector.load %arg2[%c0, %c0_0] : memref<2x32xf32, #tpu.memory_space<vmem>>, vector<2x32xf32>
    %c0_1 = arith.constant 0 : index
    %c0_2 = arith.constant 0 : index
    %1 = vector.load %arg1[%c0_1, %c0_2] : memref<32x48xf32, #tpu.memory_space<vmem>>, vector<32x48xf32>
    %cst = arith.constant dense<0.000000e+00> : vector<2x48xf32>
    %2 = tpu.matmul %0, %1, %cst {dimension_numbers = #tpu.dot_dimension_numbers<[1], [0], [0], [1], [0, 0, 1, 1], [], []>} : vector<2x32xf32>, vector<32x48xf32>, vector<2x48xf32> -> vector<2x48xf32>
    %c0_3 = arith.constant 0 : index
    %c0_4 = arith.constant 0 : index
    %3 = vector.load %arg3[%c0_3, %c0_4] : memref<2x48xf32, #tpu.memory_space<vmem>>, vector<2x48xf32>
    tpu.vector_store %arg3[%c0_3, %c0_4], %2 {strides = array<i32>} : memref<2x48xf32, #tpu.memory_space<vmem>>, vector<2x48xf32>,
    return
  }
  func.func @transform_0(%arg0: i32) -> (i32, i32) {
    %c0_i32 = arith.constant 0 : i32
    %c0_i32_0 = arith.constant 0 : i32
    %c0_i32_1 = arith.constant 0 : i32
    return %c0_i32, %c0_i32_0 : i32, i32
  }
  func.func @transform_1(%arg0: i32) -> (i32, i32) {
    %c0_i32 = arith.constant 0 : i32
    %c0_i32_0 = arith.constant 0 : i32
    return %arg0, %c0_i32 : i32, i32
  }
  func.func @transform_2(%arg0: i32) -> (i32, i32) {
    %c0_i32 = arith.constant 0 : i32
    %c0_i32_0 = arith.constant 0 : i32
    return %arg0, %c0_i32 : i32, i32
  }
}

</mosaic_0001>

<bundles_post_ra>
// kernel: tpu_custom_call.1
= control target key start
LH: loop header
LB: loop body
LE: loop exit
PB: predicated region body
PF: predicated region fallthrough
CT: control target
= control target key end

     0   :  { %7 = vsyncpa [#allocation3], 0  ;;  %s204_s0 = inlined_call_operand.hbm [shape: f32[32,48], index: 0, kind: input, shape index: {}]   ;;  %s205_s1 = inlined_call_operand.hbm [shape: f32[2,32], index: 1, kind: input, shape index: {}]   ;;  %s206_s2 = inlined_call_operand.hbm [shape: f32[2,48], index: 2, kind: output, shape index: {}]  }
   0x1   :  { %8 = vsyncpa [#allocation6], 0 }
   0x2   :  { %9 = vsyncpa [#allocation4], 0  ;;  %s14_s11 = sshll.u32 %s204_s0, 4  ;;  %s175_s12 = smov [#allocation2]   ;;  %s15_s11 = int_to_ptr.hbm [resolvable:$true] %s14_s11 }
   0x3   :  { %s16_s13 = sshll.u32 %s175_s12, 4  ;;  %s28_s16 = sshll.u32 %s205_s1, 4  ;;  %s17_s13 = int_to_ptr.vmem [resolvable:$true] %s16_s13  ;;  %s29_s16 = int_to_ptr.hbm [resolvable:$true] %s28_s16 }
   0x4   :  { %s176_s17 = smov 128   ;;  %s177_s18 = smov 8  }
   0x5   :  { %22 = dma.hbm_to_vmem [thread:$0]  %s15_s11, 512, %s17_s13, [#allocation3], %s176_s17, %s176_s17, %s177_s18  }
   0x6   :  { %s178_s19 = smov [#allocation5]  }
   0x7   :  { %s30_s20 = sshll.u32 %s178_s19, 4  ;;  %s31_s20 = int_to_ptr.vmem [resolvable:$true] %s30_s20 }
   0x8   :  { %33 = dma.hbm_to_vmem [thread:$0]  %s29_s16, 32, %s31_s20, [#allocation6]  }
   0x9   :  { %169 = dma.done.wait [#allocation3], 512  }
   0xa   :  { %170 = vsyncadd [#allocation3], 4294966784 }
   0xb   :  { %171 = dma.done.wait [#allocation6], 32  }
   0xc   :  { %172 = vsyncadd [#allocation6], 4294967264  ;;  %v46_v0 = vld [vmem:[#allocation2 + $0x18] sm:$0xff]  ;;  %v45_v1 = vld [vmem:[#allocation2 + $0x10] sm:$0xff]  ;;  %vm47_vm0 = vcmask 261120   ;;  %s179_s0 = smov [#allocation7]  }
   0xd   :  { %63 = vmatpush.msra.mxu0 %v46_v0  ;;  %v44_v2 = vld [vmem:[#allocation2 + $0x8] sm:$0xff]  ;;  %v43_v3 = vld [vmem:[#allocation2] sm:$0xff]  ;;  %s78_s1 = sshll.u32 %s179_s0, 4  ;;  %s80_s23 = sshll.u32 %s206_s2, 4  ;;  %vm71_vm1 = vcmask 386048   ;;  %s79_s1 = int_to_ptr.vmem [resolvable:$true] %s78_s1  ;;  %s81_s23 = int_to_ptr.hbm [resolvable:$true] %s80_s23 }
   0xe   :  { %v42_v4 = vld [vmem:[#allocation5] sm:$0x3] }
   0xf   :  { %64 = vmatpush.msra.mxu0 %v45_v1 }
  0x11   :  { %65 = vmatpush.msra.mxu0 %v44_v2 }
  0x13   :  { %66 = vmatpush.msra.mxu0 %v43_v3 }
  0x14   :  { %91 = vmatmul.msk.f32.vlgmr.msra.gmra.mxu0 %vm47_vm0, %v42_v4 }
  0x91   :  { %v68_v5 = vpop.f32.mrf.mxu0 }
  0x92   :  { %72 = vst.msk [vmem:[#allocation7] sm:$0x3] %vm71_vm1, %v68_v5 }
  0x93   :  { %83 = dma.vmem_to_hbm [thread:$0]  %s79_s1, 32, %s81_s23, [#allocation4]  }
  0x94   :  { %173 = dma.done.wait [#allocation4], 32  }
  0x95   :  { %174 = vsyncadd [#allocation4], 4294967264 }
  0x96   :  { %88 = vsyncpa [#allocation3], 1 }
  0x97   :  { %89 = vsyncpa [#allocation6], 1 }
  0x98   :  { %90 = vsyncpa [#allocation4], 1 }

</bundles_post_ra>
